<compile_context>
chip_gen: v6e
topology: v6e:2x2x1
jax: 0.10.0
libtpu: 0.0.40
codegen_flags: <defaults>
</compile_context>

<pallas_src>
import functools

import jax
import jax.numpy as jnp
import numpy as np
from jax.experimental import pallas as pl
from jax.experimental.pallas import tpu as pltpu


def _round_up(v, m):
    return ((v + m - 1) // m) * m


def _sage_fused_kernel(a0_ref, a1_ref, a2_ref, x_ref,
                       w0_ref, w1_ref, w2_ref,
                       b0_ref, b1_ref, b2_ref,
                       o_ref, hc_ref, *, f_pad):
    """Fused 3-layer GraphSAGE('mean') forward.

    Per layer:
      agg = adj @ h                                (row-normalized adjacency, bf16 MXU, f32 acc)
      out = [h | agg] @ [W_self ; W_neigh] + bias  (single lane-dense MXU matmul)
      h   = relu(out)                              (all but last layer)
    """

    def layer(adj_ref, h_f32, w_ref, b_ref, relu):
        h_bf = h_f32.astype(jnp.bfloat16)
        # Mean neighbor aggregation on the MXU (adjacency already row-normalized).
        agg = jnp.dot(adj_ref[...], h_bf, preferred_element_type=jnp.float32)
        # Build [h | agg] in the VMEM scratch so the self/neigh linears collapse
        # into ONE matmul with contraction depth K = 2 * f_pad.
        hc_ref[:, 0:f_pad] = h_bf
        hc_ref[:, f_pad:2 * f_pad] = agg.astype(jnp.bfloat16)
        out = jnp.dot(hc_ref[...], w_ref[...],
                      preferred_element_type=jnp.float32) + b_ref[...]
        if relu:
            out = jnp.maximum(out, 0.0)
        return out

    h = x_ref[...].astype(jnp.float32)
    h = layer(a0_ref, h, w0_ref, b0_ref, relu=True)
    h = layer(a1_ref, h, w1_ref, b1_ref, relu=True)
    h = layer(a2_ref, h, w2_ref, b2_ref, relu=False)
    o_ref[...] = h.astype(o_ref.dtype)
    # TODO(synk): Dropout(0.5) after each ReLU is omitted (eval-mode identity);
    # a training variant would use pltpu.prng_seed + pltpu.stateful_bernoulli.


def _sage_forward_impl(adjs_norm, x, params, *, lane=128):
    """Equivalent of SAGE.forward(blocks, x): 3 SAGEConv('mean') layers,
    ReLU between layers, fused into a single pallas_call."""
    assert len(adjs_norm) == 3 and len(params) == 3
    n = x.shape[0]
    out_size = params[-1][0].shape[1]

    # Lane-dense padding of all feature dims (and sublane-align the node dim).
    feat_dims = [x.shape[1]] + [w.shape[0] for (w, _, _) in params] \
        + [w.shape[1] for (w, _, _) in params]
    f_pad = _round_up(max(feat_dims), lane)
    n_pad = _round_up(n, 8)

    # Whole-array VMEM residency: keep well inside the v5e scoped-VMEM default.
    vmem_bytes = (3 * n_pad * n_pad * 2          # adjacencies (bf16)
                  + n_pad * f_pad * 4            # x (f32)
                  + 3 * 2 * f_pad * f_pad * 2    # concatenated weights (bf16)
                  + 3 * f_pad * 4                # biases (f32)
                  + n_pad * f_pad * 4            # output (f32)
                  + n_pad * 2 * f_pad * 2)       # hc scratch (bf16)
    assert vmem_bytes < 12 * 1024 * 1024, (
        "graph too large for the whole-VMEM fused kernel; tile over dst nodes")

    def pad2(a, rows, cols):
        return jnp.pad(a, ((0, rows - a.shape[0]), (0, cols - a.shape[1])))

    x_p = pad2(x.astype(jnp.float32), n_pad, f_pad)
    adjs_bf = [pad2(a, n_pad, n_pad).astype(jnp.bfloat16) for a in adjs_norm]

    ws, bs = [], []
    for (w_self, w_neigh, bias) in params:
        w_cat = jnp.concatenate(
            [pad2(w_self, f_pad, f_pad), pad2(w_neigh, f_pad, f_pad)],
            axis=0)                                      # [2*f_pad, f_pad]
        ws.append(w_cat.astype(jnp.bfloat16))
        bs.append(pad2(bias, 1, f_pad).astype(jnp.float32))

    # Advisory cost hint: 2 MXU matmuls per layer (agg + fused linear).
    flops = 3 * (2 * n_pad * n_pad * f_pad + 2 * n_pad * (2 * f_pad) * f_pad)
    cost = pl.CostEstimate(flops=flops, transcendentals=0,
                           bytes_accessed=vmem_bytes)

    kernel = functools.partial(_sage_fused_kernel, f_pad=f_pad)
    out_p = pl.pallas_call(
        kernel,
        out_shape=jax.ShapeDtypeStruct((n_pad, f_pad), jnp.float32),
        in_specs=[pl.BlockSpec(memory_space=pltpu.MemorySpace.VMEM)] * 10,
        out_specs=pl.BlockSpec(memory_space=pltpu.MemorySpace.VMEM),
        scratch_shapes=[pltpu.VMEM((n_pad, 2 * f_pad), jnp.bfloat16)],
        cost_estimate=cost,
    )(adjs_bf[0], adjs_bf[1], adjs_bf[2], x_p,
      ws[0], ws[1], ws[2], bs[0], bs[1], bs[2])

    return out_p[:n, :out_size]


# Padding / casting / weight-concat prologue fuses under jit (single dispatch).
sage_forward = jax.jit(_sage_forward_impl, static_argnames=("lane",))


def sage_forward_ref(adjs_norm, x, params):
    """Pure-JAX reference mirroring the kernel's bf16-in / f32-accumulate math."""
    h = x.astype(jnp.float32)
    n_layers = len(params)
    for l, (adj, (w_self, w_neigh, bias)) in enumerate(zip(adjs_norm, params)):
        h_bf = h.astype(jnp.bfloat16)
        a_bf = adj.astype(jnp.bfloat16)
        agg = jnp.dot(a_bf, h_bf,
                      preferred_element_type=jnp.float32).astype(jnp.bfloat16)
        out = (jnp.dot(h_bf, w_self.astype(jnp.bfloat16),
                       preferred_element_type=jnp.float32)
               + jnp.dot(agg, w_neigh.astype(jnp.bfloat16),
                         preferred_element_type=jnp.float32)
               + bias.astype(jnp.float32))
        if l != n_layers - 1:
            out = jnp.maximum(out, 0.0)
        h = out
    return h


def init_sage_params(key, in_size, hid_size, out_size, dtype=jnp.float32):
    """Deterministic parameter init for the 3 SAGEConv layers.
    Each layer: W_self [F_in, F_out], W_neigh [F_in, F_out], bias [1, F_out]."""
    dims = [(in_size, hid_size), (hid_size, hid_size), (hid_size, out_size)]
    params = []
    for (f_in, f_out) in dims:
        key, k1, k2, k3 = jax.random.split(key, 4)
        scale = 1.0 / jnp.sqrt(jnp.asarray(f_in, dtype))
        w_self = jax.random.uniform(k1, (f_in, f_out), dtype, -1.0, 1.0) * scale
        w_neigh = jax.random.uniform(k2, (f_in, f_out), dtype, -1.0, 1.0) * scale
        bias = jax.random.uniform(k3, (1, f_out), dtype, -1.0, 1.0) * scale
        params.append((w_self, w_neigh, bias))
    return params


def make_mean_adj(key, n, p=0.3, dtype=jnp.float32):
    """Random graph -> dense row-normalized (mean) adjacency [N_dst, N_src]."""
    a = (jax.random.uniform(key, (n, n)) < p).astype(dtype)
    deg = jnp.sum(a, axis=1, keepdims=True)
    return a / jnp.maximum(deg, 1.0)   # zero in-degree rows -> all-zero aggregation


if __name__ == "__main__":
    in_size, hid_size, out_size = 32, 32, 16
    n_nodes = 16

    root = jax.random.PRNGKey(0)
    k_feat, k_params, kg0, kg1, kg2 = jax.random.split(root, 5)

    x = jax.random.normal(k_feat, (n_nodes, in_size), jnp.float32)
    adjs = [make_mean_adj(kg0, n_nodes),
            make_mean_adj(kg1, n_nodes),
            make_mean_adj(kg2, n_nodes)]
    params = init_sage_params(k_params, in_size, hid_size, out_size)

    out = jax.block_until_ready(sage_forward(adjs, x, params))
    assert out.shape == (n_nodes, out_size), out.shape

    ref = jax.block_until_ready(sage_forward_ref(adjs, x, params))
    np.testing.assert_allclose(np.asarray(out), np.asarray(ref),
                               rtol=1e-3, atol=1e-3)

    print("KERNEL_OK")
</pallas_src>

<mosaic_0001>
module attributes {stable_mosaic.version = 11 : i64} {
  func.func @_sage_fused_kernel(%arg0: memref<16x16xbf16, #tpu.memory_space<vmem>>, %arg1: memref<16x16xbf16, #tpu.memory_space<vmem>>, %arg2: memref<16x16xbf16, #tpu.memory_space<vmem>>, %arg3: memref<16x128xf32, #tpu.memory_space<vmem>>, %arg4: memref<256x128xbf16, #tpu.memory_space<vmem>>, %arg5: memref<256x128xbf16, #tpu.memory_space<vmem>>, %arg6: memref<256x128xbf16, #tpu.memory_space<vmem>>, %arg7: memref<1x128xf32, #tpu.memory_space<vmem>>, %arg8: memref<1x128xf32, #tpu.memory_space<vmem>>, %arg9: memref<1x128xf32, #tpu.memory_space<vmem>>, %arg10: memref<16x128xf32, #tpu.memory_space<vmem>>, %arg11: memref<16x256xbf16, #tpu.memory_space<vmem>>) attributes {dimension_semantics = [], scalar_prefetch = 0 : i64, scratch_operands = 1 : i64, tpu.core_type = #tpu.core_type<tc>} {
    %c0 = arith.constant 0 : index
    %c0_0 = arith.constant 0 : index
    %0 = vector.load %arg3[%c0, %c0_0] : memref<16x128xf32, #tpu.memory_space<vmem>>, vector<16x128xf32>
    %1 = arith.truncf %0 : vector<16x128xf32> to vector<16x128xbf16>
    %c0_1 = arith.constant 0 : index
    %c0_2 = arith.constant 0 : index
    %2 = vector.load %arg0[%c0_1, %c0_2] : memref<16x16xbf16, #tpu.memory_space<vmem>>, vector<16x16xbf16>
    %cst = arith.constant dense<0.000000e+00> : vector<16x128xf32>
    %3 = tpu.matmul %2, %1, %cst {dimension_numbers = #tpu.dot_dimension_numbers<[1], [0], [0], [1], [0, 0, 1, 1], [], []>} : vector<16x16xbf16>, vector<16x128xbf16>, vector<16x128xf32> -> vector<16x128xf32>
    %c0_3 = arith.constant 0 : index
    %c0_4 = arith.constant 0 : index
    %4 = vector.load %arg11[%c0_3, %c0_4] : memref<16x256xbf16, #tpu.memory_space<vmem>>, vector<16x128xbf16>
    tpu.vector_store %arg11[%c0_3, %c0_4], %1 {strides = array<i32>} : memref<16x256xbf16, #tpu.memory_space<vmem>>, vector<16x128xbf16>,
    %5 = arith.truncf %3 : vector<16x128xf32> to vector<16x128xbf16>
    %c0_5 = arith.constant 0 : index
    %c128 = arith.constant 128 : index
    %6 = vector.load %arg11[%c0_5, %c128] : memref<16x256xbf16, #tpu.memory_space<vmem>>, vector<16x128xbf16>
    tpu.vector_store %arg11[%c0_5, %c128], %5 {strides = array<i32>} : memref<16x256xbf16, #tpu.memory_space<vmem>>, vector<16x128xbf16>,
    %c0_6 = arith.constant 0 : index
    %c0_7 = arith.constant 0 : index
    %7 = vector.load %arg11[%c0_6, %c0_7] : memref<16x256xbf16, #tpu.memory_space<vmem>>, vector<16x256xbf16>
    %c0_8 = arith.constant 0 : index
    %c0_9 = arith.constant 0 : index
    %8 = vector.load %arg4[%c0_8, %c0_9] : memref<256x128xbf16, #tpu.memory_space<vmem>>, vector<256x128xbf16>
    %cst_10 = arith.constant dense<0.000000e+00> : vector<16x128xf32>
    %9 = tpu.matmul %7, %8, %cst_10 {dimension_numbers = #tpu.dot_dimension_numbers<[1], [0], [0], [1], [0, 0, 1, 1], [], []>} : vector<16x256xbf16>, vector<256x128xbf16>, vector<16x128xf32> -> vector<16x128xf32>
    %c0_11 = arith.constant 0 : index
    %c0_12 = arith.constant 0 : index
    %10 = vector.load %arg7[%c0_11, %c0_12] : memref<1x128xf32, #tpu.memory_space<vmem>>, vector<1x128xf32>
    %11 = vector.broadcast %10 : vector<1x128xf32> to vector<16x128xf32>
    %12 = arith.addf %9, %11 : vector<16x128xf32>
    %cst_13 = arith.constant 0.000000e+00 : f32
    %13 = vector.broadcast %cst_13 : f32 to vector<16x128xf32>
    %14 = arith.maximumf %12, %13 : vector<16x128xf32>
    %15 = arith.truncf %14 : vector<16x128xf32> to vector<16x128xbf16>
    %c0_14 = arith.constant 0 : index
    %c0_15 = arith.constant 0 : index
    %16 = vector.load %arg1[%c0_14, %c0_15] : memref<16x16xbf16, #tpu.memory_space<vmem>>, vector<16x16xbf16>
    %cst_16 = arith.constant dense<0.000000e+00> : vector<16x128xf32>
    %17 = tpu.matmul %16, %15, %cst_16 {dimension_numbers = #tpu.dot_dimension_numbers<[1], [0], [0], [1], [0, 0, 1, 1], [], []>} : vector<16x16xbf16>, vector<16x128xbf16>, vector<16x128xf32> -> vector<16x128xf32>
    %c0_17 = arith.constant 0 : index
    %c0_18 = arith.constant 0 : index
    %18 = vector.load %arg11[%c0_17, %c0_18] : memref<16x256xbf16, #tpu.memory_space<vmem>>, vector<16x128xbf16>
    tpu.vector_store %arg11[%c0_17, %c0_18], %15 {strides = array<i32>} : memref<16x256xbf16, #tpu.memory_space<vmem>>, vector<16x128xbf16>,
    %19 = arith.truncf %17 : vector<16x128xf32> to vector<16x128xbf16>
    %c0_19 = arith.constant 0 : index
    %c128_20 = arith.constant 128 : index
    %20 = vector.load %arg11[%c0_19, %c128_20] : memref<16x256xbf16, #tpu.memory_space<vmem>>, vector<16x128xbf16>
    tpu.vector_store %arg11[%c0_19, %c128_20], %19 {strides = array<i32>} : memref<16x256xbf16, #tpu.memory_space<vmem>>, vector<16x128xbf16>,
    %c0_21 = arith.constant 0 : index
    %c0_22 = arith.constant 0 : index
    %21 = vector.load %arg11[%c0_21, %c0_22] : memref<16x256xbf16, #tpu.memory_space<vmem>>, vector<16x256xbf16>
    %c0_23 = arith.constant 0 : index
    %c0_24 = arith.constant 0 : index
    %22 = vector.load %arg5[%c0_23, %c0_24] : memref<256x128xbf16, #tpu.memory_space<vmem>>, vector<256x128xbf16>
    %cst_25 = arith.constant dense<0.000000e+00> : vector<16x128xf32>
    %23 = tpu.matmul %21, %22, %cst_25 {dimension_numbers = #tpu.dot_dimension_numbers<[1], [0], [0], [1], [0, 0, 1, 1], [], []>} : vector<16x256xbf16>, vector<256x128xbf16>, vector<16x128xf32> -> vector<16x128xf32>
    %c0_26 = arith.constant 0 : index
    %c0_27 = arith.constant 0 : index
    %24 = vector.load %arg8[%c0_26, %c0_27] : memref<1x128xf32, #tpu.memory_space<vmem>>, vector<1x128xf32>
    %25 = vector.broadcast %24 : vector<1x128xf32> to vector<16x128xf32>
    %26 = arith.addf %23, %25 : vector<16x128xf32>
    %cst_28 = arith.constant 0.000000e+00 : f32
    %27 = vector.broadcast %cst_28 : f32 to vector<16x128xf32>
    %28 = arith.maximumf %26, %27 : vector<16x128xf32>
    %29 = arith.truncf %28 : vector<16x128xf32> to vector<16x128xbf16>
    %c0_29 = arith.constant 0 : index
    %c0_30 = arith.constant 0 : index
    %30 = vector.load %arg2[%c0_29, %c0_30] : memref<16x16xbf16, #tpu.memory_space<vmem>>, vector<16x16xbf16>
    %cst_31 = arith.constant dense<0.000000e+00> : vector<16x128xf32>
    %31 = tpu.matmul %30, %29, %cst_31 {dimension_numbers = #tpu.dot_dimension_numbers<[1], [0], [0], [1], [0, 0, 1, 1], [], []>} : vector<16x16xbf16>, vector<16x128xbf16>, vector<16x128xf32> -> vector<16x128xf32>
    %c0_32 = arith.constant 0 : index
    %c0_33 = arith.constant 0 : index
    %32 = vector.load %arg11[%c0_32, %c0_33] : memref<16x256xbf16, #tpu.memory_space<vmem>>, vector<16x128xbf16>
    tpu.vector_store %arg11[%c0_32, %c0_33], %29 {strides = array<i32>} : memref<16x256xbf16, #tpu.memory_space<vmem>>, vector<16x128xbf16>,
    %33 = arith.truncf %31 : vector<16x128xf32> to vector<16x128xbf16>
    %c0_34 = arith.constant 0 : index
    %c128_35 = arith.constant 128 : index
    %34 = vector.load %arg11[%c0_34, %c128_35] : memref<16x256xbf16, #tpu.memory_space<vmem>>, vector<16x128xbf16>
    tpu.vector_store %arg11[%c0_34, %c128_35], %33 {strides = array<i32>} : memref<16x256xbf16, #tpu.memory_space<vmem>>, vector<16x128xbf16>,
    %c0_36 = arith.constant 0 : index
    %c0_37 = arith.constant 0 : index
    %35 = vector.load %arg11[%c0_36, %c0_37] : memref<16x256xbf16, #tpu.memory_space<vmem>>, vector<16x256xbf16>
    %c0_38 = arith.constant 0 : index
    %c0_39 = arith.constant 0 : index
    %36 = vector.load %arg6[%c0_38, %c0_39] : memref<256x128xbf16, #tpu.memory_space<vmem>>, vector<256x128xbf16>
    %cst_40 = arith.constant dense<0.000000e+00> : vector<16x128xf32>
    %37 = tpu.matmul %35, %36, %cst_40 {dimension_numbers = #tpu.dot_dimension_numbers<[1], [0], [0], [1], [0, 0, 1, 1], [], []>} : vector<16x256xbf16>, vector<256x128xbf16>, vector<16x128xf32> -> vector<16x128xf32>
    %c0_41 = arith.constant 0 : index
    %c0_42 = arith.constant 0 : index
    %38 = vector.load %arg9[%c0_41, %c0_42] : memref<1x128xf32, #tpu.memory_space<vmem>>, vector<1x128xf32>
    %39 = vector.broadcast %38 : vector<1x128xf32> to vector<16x128xf32>
    %40 = arith.addf %37, %39 : vector<16x128xf32>
    %c0_43 = arith.constant 0 : index
    %c0_44 = arith.constant 0 : index
    %41 = vector.load %arg10[%c0_43, %c0_44] : memref<16x128xf32, #tpu.memory_space<vmem>>, vector<16x128xf32>
    tpu.vector_store %arg10[%c0_43, %c0_44], %40 {strides = array<i32>} : memref<16x128xf32, #tpu.memory_space<vmem>>, vector<16x128xf32>,
    return
  }
}

</mosaic_0001>

<bundles_post_ra>
// kernel: _sage_forward_impl.1
= control target key start
LH: loop header
LB: loop body
LE: loop exit
PB: predicated region body
PF: predicated region fallthrough
CT: control target
= control target key end

     0   :  { %v1133_v2 = vmov 0.0   ;;  %vm1134_vm0 = vmmov 0   ;;  %vm47_vm1 = vcmask 130048   ;;  %s1376_s0 = inlined_call_operand.vmem [shape: bf16[16,16], index: 0, kind: input, shape index: {}]   ;;  %s1377_s1 = inlined_call_operand.vmem [shape: bf16[16,16], index: 1, kind: input, shape index: {}]   ;;  %s1378_s2 = inlined_call_operand.vmem [shape: bf16[16,16], index: 2, kind: input, shape index: {}]   ;;  %s1379_s3 = inlined_call_operand.vmem [shape: f32[16,128], index: 3, kind: input, shape index: {}]   ;;  %s1380_s4 = inlined_call_operand.vmem [shape: bf16[256,128], index: 4, kind: input, shape index: {}]   ;;  %s1381_s5 = inlined_call_operand.vmem [shape: bf16[256,128], index: 5, kind: input, shape index: {}]   ;;  %s1382_s6 = inlined_call_operand.vmem [shape: bf16[256,128], index: 6, kind: input, shape index: {}]   ;;  %s1383_s7 = inlined_call_operand.vmem [shape: f32[1,128], index: 7, kind: input, shape index: {}]   ;;  %s1384_s8 = inlined_call_operand.vmem [shape: f32[1,128], index: 8, kind: input, shape index: {}]   ;;  %s1385_s9 = inlined_call_operand.vmem [shape: f32[1,128], index: 9, kind: input, shape index: {}]   ;;  %s1386_s10 = inlined_call_operand.hbm [shape: f32[16,128], index: 10, kind: output, shape index: {}]  }
   0x1   :  { %v37_v0 = vld [vmem:[%s1379_s3] sm:$0xff]  ;;  %v38_v1 = vld [vmem:[%s1379_s3 + $0x8] sm:$0xff]  ;;  %1037 = vmatprep.subr.bf16.mxu0 %v1133_v2  ;;  %1039 = vmatprep.mubr.msk.bf16.mxu0 %vm1134_vm0, %v1133_v2  ;;  %v1061_v5 = vld [vmem:[%s1380_s4 + $0x78] sm:$0xff]  }
   0x2   :  { %v39_v3 = vpack.c.bf16 %v38_v1, %v37_v0  ;;  %v1060_v4 = vld [vmem:[%s1376_s0] sm:$0xff]   ;;  %v1062_v6 = vld [vmem:[%s1380_s4 + $0x38] sm:$0xff]   ;;  %967 = vmatprep.subr.bf16.mxu1 %v1061_v5  ;;  %v1063_v7 = vld [vmem:[%s1380_s4 + $0x70] sm:$0xff]  }
   0x3   :  { %968 = vmatpush3.bf16.msra.mxu1 %v1062_v6  ;;  %v1064_v8 = vld [vmem:[%s1380_s4 + $0x30] sm:$0xff]   ;;  %v1065_v9 = vld [vmem:[%s1380_s4 + $0x68] sm:$0xff]   ;;  %v1067_v11 = vld [vmem:[%s1380_s4 + $0x60] sm:$0xff]  }
   0x4   :  { %1038 = vmatpush3.bf16.msra.mxu0 %v39_v3  ;;  %969 = vmatprep.subr.bf16.mxu1 %v1063_v7  ;;  %v1066_v10 = vld [vmem:[%s1380_s4 + $0x28] sm:$0xff]   ;;  %v1068_v12 = vld [vmem:[%s1380_s4 + $0x20] sm:$0xff]   ;;  %v1069_v13 = vld [vmem:[%s1380_s4 + $0x58] sm:$0xff]  }
   0x5   :  { %1043 = vmatprep.subr.bf16.mxu0 %v1133_v2  ;;  %v1070_v14 = vld [vmem:[%s1380_s4 + $0x18] sm:$0xff]   ;;  %v1071_v15 = vld [vmem:[%s1380_s4 + $0x50] sm:$0xff]  }
   0x6   :  { %v1072_v16 = vld [vmem:[%s1380_s4 + $0x10] sm:$0xff]  }
   0x7   :  { %1040 = vmatmul.mubr.msk.bf16.vlgmr.msra.gmra.mxu0 %vm47_vm1, %v1060_v4  ;;  %970 = vmatpush3.bf16.msra.mxu1 %v1064_v8 }
   0x8   :  { %1045 = vmatprep.mubr.msk.bf16.mxu0 %vm1134_vm0, %v1133_v2  ;;  %971 = vmatprep.subr.bf16.mxu1 %v1065_v9 }
   0xb   :  { %972 = vmatpush3.bf16.msra.mxu1 %v1066_v10 }
   0xc   :  { %973 = vmatprep.subr.bf16.mxu1 %v1067_v11 }
   0xf   :  { %974 = vmatpush3.bf16.msra.mxu1 %v1068_v12 }
  0x10   :  { %975 = vmatprep.subr.bf16.mxu1 %v1069_v13 }
  0x13   :  { %976 = vmatpush3.bf16.msra.mxu1 %v1070_v14 }
  0x14   :  { %977 = vmatprep.subr.bf16.mxu1 %v1071_v15 }
  0x17   :  { %978 = vmatpush3.bf16.msra.mxu1 %v1072_v16 }
  0x18   :  { %15 = vsyncpa [#allocation4], 0  ;;  %v1073_v17 = vld [vmem:[%s1380_s4 + $0x48] sm:$0xff]   ;;  %v1075_v19 = vld [vmem:[%s1380_s4 + $0x40] sm:$0xff]   ;;  %s1135_s23 = smov [#allocation3]  }
  0x19   :  { %v1074_v18 = vld [vmem:[%s1380_s4 + $0x8] sm:$0xff]   ;;  %979 = vmatprep.subr.bf16.mxu1 %v1073_v17  ;;  %v1076_v20 = vld [vmem:[%s1380_s4] sm:$0xff]   ;;  %v1078_v37 = vld [vmem:[%s1381_s5 + $0x78] sm:$0xff]  }
  0x1a   :  { %v845_v29 = vld [vmem:[%s1383_s7] ss:$0 sm:$0xff]  ;;  %v1079_v40 = vld [vmem:[%s1381_s5 + $0x38] sm:$0xff]   ;;  %v1080_v41 = vld [vmem:[%s1381_s5 + $0x70] sm:$0xff]  }
  0x1b   :  { %980 = vmatpush3.bf16.msra.mxu1 %v1074_v18  ;;  %v1077_v39 = vld [vmem:[%s1377_s1] sm:$0xff]   ;;  %v1081_v42 = vld [vmem:[%s1381_s5 + $0x30] sm:$0xff]   ;;  %v1082_v43 = vld [vmem:[%s1381_s5 + $0x68] sm:$0xff]  }
  0x1c   :  { %981 = vmatprep.subr.bf16.mxu1 %v1075_v19  ;;  %v1083_v44 = vld [vmem:[%s1381_s5 + $0x28] sm:$0xff]   ;;  %v1084_v45 = vld [vmem:[%s1381_s5 + $0x60] sm:$0xff]   ;;  %v1086_v47 = vld [vmem:[%s1381_s5 + $0x58] sm:$0xff]  }
  0x1d   :  { %v1085_v46 = vld [vmem:[%s1381_s5 + $0x20] sm:$0xff]   ;;  %v1087_v48 = vld [vmem:[%s1381_s5 + $0x18] sm:$0xff]   ;;  %v1088_v49 = vld [vmem:[%s1381_s5 + $0x50] sm:$0xff]  }
  0x1e   :  { %v1089_v50 = vld [vmem:[%s1381_s5 + $0x10] sm:$0xff]   ;;  %v1090_v51 = vld [vmem:[%s1381_s5 + $0x48] sm:$0xff]   ;;  %v1092_v53 = vld [vmem:[%s1381_s5 + $0x40] sm:$0xff]  }
  0x1f   :  { %982 = vmatpush3.bf16.msra.mxu1 %v1076_v20  ;;  %v1091_v52 = vld [vmem:[%s1381_s5 + $0x8] sm:$0xff]   ;;  %v1093_v54 = vld [vmem:[%s1381_s5] sm:$0xff]   ;;  %v1095_v60 = vld [vmem:[%s1382_s6 + $0x78] sm:$0xff]  }
  0x20   :  { %v1096_v61 = vld [vmem:[%s1382_s6 + $0x38] sm:$0xff]   ;;  %v1097_v62 = vld [vmem:[%s1382_s6 + $0x70] sm:$0xff]   ;;  %1015 = vmatprep.subr.bf16.mxu1 %v1095_v60  ;;  %v1099_v0 = vld [vmem:[%s1382_s6 + $0x68] sm:$0xff]  }
  0x21   :  { %v1098_v63 = vld [vmem:[%s1382_s6 + $0x30] sm:$0xff]   ;;  %v1100_v1 = vld [vmem:[%s1382_s6 + $0x28] sm:$0xff]   ;;  %v1103_v4 = vld [vmem:[%s1382_s6 + $0x58] sm:$0xff]  }
  0x22   :  { %v1104_v5 = vld [vmem:[%s1382_s6 + $0x18] sm:$0xff]   ;;  %v1105_v6 = vld [vmem:[%s1382_s6 + $0x50] sm:$0xff]   ;;  %v870_v11 = vld [vmem:[%s1384_s8] ss:$0 sm:$0xff] }
  0x23   :  { %v1106_v7 = vld [vmem:[%s1382_s6 + $0x10] sm:$0xff]   ;;  %v1094_v20 = vld [vmem:[%s1378_s2] sm:$0xff]  }
  0xc7   :  { %v85_v21 = vpop.f32.mrf.mxu0 }
  0xc9   :  { %v1041_v22 = vpop.f32.mrf.mxu0 }
  0xca   :  { %v1108_v22 = vld [vmem:[%s1382_s6 + $0x8] sm:$0xff]  }
  0xcb   :  { %v88_v23 = vpop.f32.mrf.mxu0 }
  0xcc   :  { %v960_v24 = vpack.c.bf16 %v88_v23, %v85_v21  ;;  %v1107_v21 = vld [vmem:[%s1382_s6 + $0x48] sm:$0xff]   ;;  %v1109_v23 = vld [vmem:[%s1382_s6 + $0x40] sm:$0xff]  }
  0xcd   :  { %v1042_v25 = vpop.f32.mrf.mxu0 }
  0xce   :  { %290 = vmatprep.mubr.bf16.mxu1 %v960_v24  ;;  %v1110_v24 = vld [vmem:[%s1382_s6] sm:$0xff]  }
  0xcf   :  { %291 = vmatmul.mubr.bf16.vlgmr.msra.gmra.mxu1 %v39_v3  ;;  %v1102_v3 = vld [vmem:[%s1382_s6 + $0x20] sm:$0xff]  }
  0xd0   :  { %1016 = vmatpush3.bf16.msra.mxu1 %v1096_v61 }
  0xd1   :  { %1017 = vmatprep.subr.bf16.mxu1 %v1097_v62 }
  0xd4   :  { %1018 = vmatpush3.bf16.msra.mxu1 %v1098_v63 }
  0xd5   :  { %1019 = vmatprep.subr.bf16.mxu1 %v1099_v0 }
  0xd8   :  { %1020 = vmatpush3.bf16.msra.mxu1 %v1100_v1 }
 0x18f   :  { %v983_v26 = vpop.f32.mrf.mxu1 }
 0x191   :  { %v984_v27 = vpop.f32.mrf.mxu1 }
 0x192   :  { %v985_v28 = vadd.f32 %v984_v27, %v983_v26 }
 0x193   :  { %v986_v30 = vpop.f32.mrf.mxu1 }
 0x194   :  { %v293_v32 = vadd.f32 %v985_v28, %v845_v29 }
 0x195   :  { %v987_v31 = vpop.f32.mrf.mxu1 }
 0x196   :  { %v988_v33 = vadd.f32 %v987_v31, %v986_v30  ;;  %v299_v35 = vmax.f32 %v293_v32, 0.0  ;;  %v895_v31 = vld [vmem:[%s1385_s9] ss:$0 sm:$0xff] }
 0x198   :  { %v296_v34 = vadd.f32 %v988_v33, %v845_v29 }
 0x19a   :  { %v300_v36 = vmax.f32 %v296_v34, 0.0 }
 0x19c   :  { %v301_v38 = vpack.c.bf16 %v300_v36, %v299_v35 }
 0x19e   :  { %1044 = vmatpush3.bf16.msra.mxu0 %v301_v38 }
 0x19f   :  { %991 = vmatprep.subr.bf16.mxu0 %v1078_v37 }
 0x1a1   :  { %1046 = vmatmul.mubr.msk.bf16.vlgmr.msra.gmra.mxu0 %vm47_vm1, %v1077_v39 }
 0x1a2   :  { %992 = vmatpush3.bf16.msra.mxu0 %v1079_v40 }
 0x1a3   :  { %993 = vmatprep.subr.bf16.mxu0 %v1080_v41 }
 0x1a6   :  { %994 = vmatpush3.bf16.msra.mxu0 %v1081_v42 }
 0x1a7   :  { %995 = vmatprep.subr.bf16.mxu0 %v1082_v43 }
 0x1aa   :  { %996 = vmatpush3.bf16.msra.mxu0 %v1083_v44 }
 0x1ab   :  { %997 = vmatprep.subr.bf16.mxu0 %v1084_v45 }
 0x1ae   :  { %998 = vmatpush3.bf16.msra.mxu0 %v1085_v46 }
 0x1af   :  { %999 = vmatprep.subr.bf16.mxu0 %v1086_v47 }
 0x1b2   :  { %1000 = vmatpush3.bf16.msra.mxu0 %v1087_v48 }
 0x1b3   :  { %1001 = vmatprep.subr.bf16.mxu0 %v1088_v49 }
 0x1b6   :  { %1002 = vmatpush3.bf16.msra.mxu0 %v1089_v50 }
 0x1b7   :  { %1003 = vmatprep.subr.bf16.mxu0 %v1090_v51 }
 0x1ba   :  { %1004 = vmatpush3.bf16.msra.mxu0 %v1091_v52 }
 0x1bb   :  { %1005 = vmatprep.subr.bf16.mxu0 %v1092_v53 }
 0x1be   :  { %1006 = vmatpush3.bf16.msra.mxu0 %v1093_v54 }
 0x1bf   :  { %1049 = vmatprep.subr.bf16.mxu0 %v1133_v2 }
 0x261   :  { %v346_v55 = vpop.f32.mrf.mxu0 }
 0x263   :  { %v1047_v56 = vpop.f32.mrf.mxu0 }
 0x265   :  { %v349_v57 = vpop.f32.mrf.mxu0 }
 0x266   :  { %v962_v58 = vpack.c.bf16 %v349_v57, %v346_v55 }
 0x267   :  { %v1048_v59 = vpop.f32.mrf.mxu0 }
 0x268   :  { %551 = vmatprep.mubr.bf16.mxu0 %v962_v58 }
 0x269   :  { %552 = vmatmul.mubr.bf16.vlgmr.msra.gmra.mxu0 %v301_v38 }
 0x26a   :  { %1051 = vmatprep.mubr.msk.bf16.mxu0 %vm1134_vm0, %v1133_v2  ;;  %v1101_v2 = vld [vmem:[%s1382_s6 + $0x60] sm:$0xff]   ;;  %s828_s6 = sshll.u32 %s1135_s23, 4  ;;  %s829_s6 = int_to_ptr.vmem [resolvable:$true] %s828_s6 }
 0x26b   :  { %1021 = vmatprep.subr.bf16.mxu1 %v1101_v2  ;;  %s1111_s24 = scalar_lea.vmem %s829_s6, 256  ;;  %p1116_p1 = scmp.lt.s32.totalorder %s829_s6, %s829_s6 }
 0x26c   :  { %1022 = vmatpush3.bf16.msra.mxu1 %v1102_v3  ;;  %p1112_p0 = scmp.ne.s32.totalorder %s829_s6, %s1111_s24  ;;  %p1117_p2 = scmp.lt.s32.totalorder %s1111_s24, %s1111_s24 }
 0x26d   :  { %1023 = vmatprep.subr.bf16.mxu1 %v1103_v4 }
 0x26e   :  { %p1118_p3 = por %p1117_p2, %p1116_p1 }
 0x270   :  { %1024 = vmatpush3.bf16.msra.mxu1 %v1104_v5  ;;  %p1119_p4 = pnand %p1118_p3, %p1112_p0 }
 0x271   :  { %1025 = vmatprep.subr.bf16.mxu1 %v1105_v6 }
 0x274   :  { %1026 = vmatpush3.bf16.msra.mxu1 %v1106_v7 }
 0x275   :  { %1027 = vmatprep.subr.bf16.mxu1 %v1107_v21 }
 0x278   :  { %1028 = vmatpush3.bf16.msra.mxu1 %v1108_v22 }
 0x279   :  { %1029 = vmatprep.subr.bf16.mxu1 %v1109_v23 }
 0x27c   :  { %1030 = vmatpush3.bf16.msra.mxu1 %v1110_v24 }
 0x329   :  { %v1007_v8 = vpop.f32.mrf.mxu0 }
 0x32b   :  { %v1008_v9 = vpop.f32.mrf.mxu0 }
 0x32c   :  { %v1009_v10 = vadd.f32 %v1008_v9, %v1007_v8 }
 0x32d   :  { %v1010_v12 = vpop.f32.mrf.mxu0 }
 0x32e   :  { %v554_v14 = vadd.f32 %v1009_v10, %v870_v11 }
 0x32f   :  { %v1011_v13 = vpop.f32.mrf.mxu0 }
 0x330   :  { %v1012_v15 = vadd.f32 %v1011_v13, %v1010_v12  ;;  %v560_v17 = vmax.f32 %v554_v14, 0.0 }
 0x332   :  { %v557_v16 = vadd.f32 %v1012_v15, %v870_v11 }
 0x334   :  { %v561_v18 = vmax.f32 %v557_v16, 0.0 }
 0x336   :  { %v562_v19 = vpack.c.bf16 %v561_v18, %v560_v17 }
 0x338   :  { %1050 = vmatpush3.bf16.msra.mxu0 %v562_v19 }
 0x33b   :  { %1052 = vmatmul.mubr.msk.bf16.vlgmr.msra.gmra.mxu0 %vm47_vm1, %v1094_v20 }
 0x3fb   :  { %v607_v25 = vpop.f32.mrf.mxu0 }
 0x3fd   :  { %v1053_v26 = vpop.f32.mrf.mxu0 }
 0x3ff   :  { %v610_v27 = vpop.f32.mrf.mxu0 }
 0x400   :  { %v964_v28 = vpack.c.bf16 %v610_v27, %v607_v25 }
 0x401   :  { %v1054_v29 = vpop.f32.mrf.mxu0 }
 0x402   :  { %812 = vmatprep.mubr.bf16.mxu1 %v964_v28 }
 0x403   :  { %813 = vmatmul.mubr.bf16.vlgmr.msra.gmra.mxu1 %v562_v19 }
 0x4c3   :  { %v1031_v30 = vpop.f32.mrf.mxu1 }
 0x4c5   :  { %v1032_v32 = vpop.f32.mrf.mxu1 }
 0x4c6   :  { %v1033_v33 = vadd.f32 %v1032_v32, %v1031_v30 }
 0x4c7   :  { %v1034_v34 = vpop.f32.mrf.mxu1 }
 0x4c8   :  { %v815_v35 = vadd.f32 %v1033_v33, %v895_v31 }
 0x4c9   :  { %v1035_v36 = vpop.f32.mrf.mxu1 }
 0x4ca   :  { %821 = vst [vmem:[#allocation3] sm:$0xff] %v815_v35  ;;  %v1036_v37 = vadd.f32 %v1035_v36, %v1034_v34 }
 0x4cc   :  { %v818_v38 = vadd.f32 %v1036_v37, %v895_v31 }
 0x4ce   :  { %822 = vst [vmem:[#allocation3 + $0x8] sm:$0xff] %v818_v38 }
 0x4cf   :  { %1122 = shalt.err (!%p1119_p4)
}
 0x4d0   :  { %s1136_s9 = smov 128   ;;  %s1137_s0 = smov 8  }
 0x4d1   :  { %834 = dma.vmem_to_hbm [thread:$0]  %s829_s6, 256, %s1386_s10, [#allocation4], %s1136_s9, %s1136_s9, %s1137_s0  }
 0x4d2   :  { %1131 = dma.done.wait [#allocation4], 256  }
 0x4d3   :  { %1132 = vsyncadd [#allocation4], 4294967040 }
 0x4d4   :  { %838 = vsyncpa [#allocation4], 1 }

</bundles_post_ra>
